<compile_context>
chip_gen: v7x
topology: tpu7x:2x2x1
jax: 0.10.0
libtpu: 0.0.40
codegen_flags: <defaults>
</compile_context>

<pallas_src>
import functools

import jax
import jax.numpy as jnp
from jax.experimental import pallas as pl
from jax.experimental.pallas import tpu as pltpu


def _round_up(x, m):
    return -(-x // m) * m


# --------------------------------------------------------------------------
# Pallas kernel: fused MSE + negative-parameter penalty reduction
# --------------------------------------------------------------------------
def _loss_sc_kernel(fit_ref, true_ref, params_ref, out_ref, acc_ref, *,
                    tile, nrows, inv_n, need_mask):
    i = pl.program_id(0)

    @pl.when(i == 0)
    def _init():
        acc_ref[...] = jnp.zeros_like(acc_ref)

    # Stream native dtype, upcast in-kernel (free under DMA).
    d = fit_ref[...].astype(jnp.float32) - true_ref[...].astype(jnp.float32)
    sq = d * d

    if need_mask:
        # Only the last (partial) row-tile contains rows beyond the array; the
        # DMA leaves those rows undefined, so zero them before accumulating.
        row_ids = i * tile + jax.lax.broadcasted_iota(jnp.int32, (tile, 128), 0)
        sq = jnp.where(row_ids < nrows, sq, jnp.float32(0.0))

    # Vector accumulate: (tile,128) -> (tile//8, 8, 128), sum over axis 0 is a
    # chain of VPU vreg adds into the resident (8,128) accumulator.  The
    # cross-lane/sublane reduce happens once, in the finalize branch.
    acc_ref[...] += jnp.sum(sq.reshape(tile // 8, 8, 128), axis=0)

    @pl.when(i == pl.num_programs(0) - 1)
    def _finalize():
        # sum_p sum(relu(-p)) * 10 ; params slab is resident, reduced once.
        neg = jnp.maximum(-params_ref[...].astype(jnp.float32), jnp.float32(0.0))
        penalty = jnp.sum(neg) * jnp.float32(10.0)
        out_ref[0, 0] = jnp.sum(acc_ref[...]) * jnp.float32(inv_n) + penalty


def _pack_params(params):
    """Flatten + concat all parameters, zero-pad to a full (>=8, 128) f32 tile."""
    flat = jnp.concatenate([jnp.ravel(p).astype(jnp.float32) for p in params])
    n = flat.shape[0]
    rows = max(-(-n // 128), 8)          # lane-dense, at least one (8,128) tile
    rows = _round_up(rows, 8)            # sublane-align
    flat = jnp.pad(flat, (0, rows * 128 - n))
    return flat.reshape(rows, 128)


def _default_block_rows():
    """Generation-dependent row tile (128 lanes wide, f32)."""
    try:
        kind = jax.devices()[0].device_kind.lower()
    except Exception:
        return 2048
    if "v7" in kind or "7x" in kind:
        return 4096     # 2 MiB / block / input; 8 MiB double-buffered inputs
    return 2048         # v5e / v6e: 1 MiB / block / input; 4 MiB double-buffered


def loss_sc(gs_fit, gs_true, params, *, block_rows=None):
    """Pallas implementation of lossSC.forward(scm, gs_fit, gs_true)."""
    assert gs_fit.shape == gs_true.shape
    n = gs_fit.size
    if block_rows is None:
        block_rows = _default_block_rows()
    assert block_rows > 0 and block_rows % 8 == 0

    # Lane-dense layout: (rows, 128) in the *native* dtype.  When n is a
    # multiple of 128 this is a free reshape (no HBM copy).
    pad = (-n) % 128
    if pad:
        # TODO(synk): handle the ragged (<128-element) tail without a full-array
        # pad (e.g. tiny plain-JAX tail sum) to avoid this copy for huge inputs.
        fit_flat = jnp.pad(jnp.ravel(gs_fit), (0, pad))
        true_flat = jnp.pad(jnp.ravel(gs_true), (0, pad))
    else:
        fit_flat = jnp.ravel(gs_fit)
        true_flat = jnp.ravel(gs_true)
    rows = (n + pad) // 128
    fit2d = fit_flat.reshape(rows, 128)
    true2d = true_flat.reshape(rows, 128)

    tile = min(block_rows, _round_up(rows, 8))
    grid = (pl.cdiv(rows, tile),)
    need_mask = (rows % tile) != 0       # only the last block can be partial

    packed = _pack_params(params)
    p_rows = packed.shape[0]

    kernel = functools.partial(
        _loss_sc_kernel,
        tile=tile, nrows=rows, inv_n=1.0 / float(n), need_mask=need_mask)

    out = pl.pallas_call(
        kernel,
        out_shape=jax.ShapeDtypeStruct((1, 1), jnp.float32),
        grid_spec=pltpu.PrefetchScalarGridSpec(
            num_scalar_prefetch=0,
            grid=grid,
            in_specs=[
                pl.BlockSpec((tile, 128), lambda i: (i, 0)),
                pl.BlockSpec((tile, 128), lambda i: (i, 0)),
                # params: same block every step -> resident, DMA'd once.
                pl.BlockSpec((p_rows, 128), lambda i: (0, 0)),
            ],
            out_specs=pl.BlockSpec((1, 1), lambda i: (0, 0),
                                   memory_space=pltpu.MemorySpace.SMEM),
            scratch_shapes=[pltpu.VMEM((8, 128), jnp.float32)],
        ),
        compiler_params=pltpu.CompilerParams(
            dimension_semantics=("arbitrary",)),
    )(fit2d, true2d, packed)
    return out[0, 0]


# --------------------------------------------------------------------------
# Pure-JAX reference (for a correctness check of the kernel)
# --------------------------------------------------------------------------
def loss_sc_ref(gs_fit, gs_true, params):
    loss = jnp.mean((gs_fit.astype(jnp.float32) - gs_true.astype(jnp.float32)) ** 2)
    for p in params:
        loss = loss + jnp.sum(jax.nn.relu(-p.astype(jnp.float32))) * 10.0
    return loss


if __name__ == "__main__":
    key = jax.random.PRNGKey(0)
    k_fit, k_true, k_w1, k_b1, k_w2, k_b2, k_g0, k_g1 = jax.random.split(key, 8)

    # gs_fit / gs_true: stomatal conductance predictions vs. observations
    # small shape: batch=8, seq=16
    gs_fit = jax.random.normal(k_fit, (8, 16), dtype=jnp.float32)
    gs_true = jax.random.normal(k_true, (8, 16), dtype=jnp.float32)

    # Deterministic synthetic parameters of a small stomatal-conductance model
    # (scm): a tiny MLP (4 -> 32 -> 1) plus two scalar physiological params.
    # Some values are negative so the relu(-p) penalty is exercised.
    scm_params = [
        jax.random.normal(k_w1, (32, 4), dtype=jnp.float32) * 0.5,   # w1
        jax.random.normal(k_b1, (32,), dtype=jnp.float32) * 0.1,     # b1
        jax.random.normal(k_w2, (1, 32), dtype=jnp.float32) * 0.5,   # w2
        jax.random.normal(k_b2, (1,), dtype=jnp.float32) * 0.1,      # b2
        jax.random.normal(k_g0, (1,), dtype=jnp.float32),            # g0
        jax.random.normal(k_g1, (1,), dtype=jnp.float32),            # g1
    ]

    # Small case (single grid step, lane-aligned, rows < tile -> masked).
    loss = loss_sc(gs_fit, gs_true, scm_params)
    jax.block_until_ready(loss)
    ref = loss_sc_ref(gs_fit, gs_true, scm_params)
    assert jnp.allclose(loss, ref, rtol=1e-5, atol=1e-5), (loss, ref)

    # Multi-step accumulator path with a partial last block (50 rows, tile=16).
    k_fit2, k_true2 = jax.random.split(jax.random.PRNGKey(1), 2)
    gs_fit2 = jax.random.normal(k_fit2, (64, 100), dtype=jnp.float32)
    gs_true2 = jax.random.normal(k_true2, (64, 100), dtype=jnp.float32)
    loss2 = loss_sc(gs_fit2, gs_true2, scm_params, block_rows=16)
    jax.block_until_ready(loss2)
    ref2 = loss_sc_ref(gs_fit2, gs_true2, scm_params)
    assert jnp.allclose(loss2, ref2, rtol=1e-5, atol=1e-5), (loss2, ref2)

    # Multi-step, evenly divided path (no masking: 128 rows, tile=32).
    k_fit3, k_true3 = jax.random.split(jax.random.PRNGKey(2), 2)
    gs_fit3 = jax.random.normal(k_fit3, (32, 512), dtype=jnp.float32)
    gs_true3 = jax.random.normal(k_true3, (32, 512), dtype=jnp.float32)
    loss3 = loss_sc(gs_fit3, gs_true3, scm_params, block_rows=32)
    jax.block_until_ready(loss3)
    ref3 = loss_sc_ref(gs_fit3, gs_true3, scm_params)
    assert jnp.allclose(loss3, ref3, rtol=1e-5, atol=1e-5), (loss3, ref3)

    # Ragged n (not a multiple of 128) -> pad-fallback path.
    k_fit4, k_true4 = jax.random.split(jax.random.PRNGKey(3), 2)
    gs_fit4 = jax.random.normal(k_fit4, (7, 13), dtype=jnp.float32)
    gs_true4 = jax.random.normal(k_true4, (7, 13), dtype=jnp.float32)
    loss4 = loss_sc(gs_fit4, gs_true4, scm_params)
    jax.block_until_ready(loss4)
    ref4 = loss_sc_ref(gs_fit4, gs_true4, scm_params)
    assert jnp.allclose(loss4, ref4, rtol=1e-5, atol=1e-5), (loss4, ref4)

    print("KERNEL_OK")
</pallas_src>

<mosaic_0001>
module attributes {stable_mosaic.version = 11 : i64} {
  func.func @_loss_sc_kernel(%arg0: i32, %arg1: memref<8x128xf32, #tpu.memory_space<vmem>>, %arg2: memref<8x128xf32, #tpu.memory_space<vmem>>, %arg3: memref<8x128xf32, #tpu.memory_space<vmem>>, %arg4: memref<1x1xf32, #tpu.memory_space<smem>>, %arg5: memref<8x128xf32, #tpu.memory_space<vmem>>) attributes {dimension_semantics = [#tpu.dimension_semantics<arbitrary>], iteration_bounds = array<i64: 1>, scalar_prefetch = 0 : i64, scratch_operands = 1 : i64, tpu.core_type = #tpu.core_type<tc>, window_params = [{transform_indices = @transform_0, window_bounds = array<i64: 8, 128>}, {transform_indices = @transform_1, window_bounds = array<i64: 8, 128>}, {pipeline_mode = #tpu.pipeline_mode<synchronous>, transform_indices = @transform_2, window_bounds = array<i64: 8, 128>}, {transform_indices = @transform_3, window_bounds = array<i64: 1, 1>}]} {
    %c0_i32 = arith.constant 0 : i32
    %0 = arith.cmpi eq, %arg0, %c0_i32 : i32
    %1 = arith.extui %0 : i1 to i32
    %c0_i32_0 = arith.constant 0 : i32
    %2 = arith.cmpi ne, %1, %c0_i32_0 : i32
    scf.if %2 {
      %cst_11 = arith.constant 0.000000e+00 : f32
      %23 = vector.broadcast %cst_11 : f32 to vector<8x128xf32>
      %c0_12 = arith.constant 0 : index
      %c0_13 = arith.constant 0 : index
      %24 = vector.load %arg5[%c0_12, %c0_13] : memref<8x128xf32, #tpu.memory_space<vmem>>, vector<8x128xf32>
      tpu.vector_store %arg5[%c0_12, %c0_13], %23 {strides = array<i32>} : memref<8x128xf32, #tpu.memory_space<vmem>>, vector<8x128xf32>,
    } else {
    }
    %c0 = arith.constant 0 : index
    %c0_1 = arith.constant 0 : index
    %3 = vector.load %arg1[%c0, %c0_1] : memref<8x128xf32, #tpu.memory_space<vmem>>, vector<8x128xf32>
    %c0_2 = arith.constant 0 : index
    %c0_3 = arith.constant 0 : index
    %4 = vector.load %arg2[%c0_2, %c0_3] : memref<8x128xf32, #tpu.memory_space<vmem>>, vector<8x128xf32>
    %5 = arith.subf %3, %4 : vector<8x128xf32>
    %6 = arith.mulf %5, %5 : vector<8x128xf32>
    %c8_i32 = arith.constant 8 : i32
    %7 = arith.muli %arg0, %c8_i32 : i32
    %8 = tpu.iota {dimensions = array<i32: 0>} : vector<8x128xi32>
    %9 = vector.broadcast %7 : i32 to vector<8x128xi32>
    %10 = arith.addi %9, %8 : vector<8x128xi32>
    %c1_i32 = arith.constant 1 : i32
    %11 = vector.broadcast %c1_i32 : i32 to vector<8x128xi32>
    %12 = arith.cmpi slt, %10, %11 : vector<8x128xi32>
    %cst = arith.constant 0.000000e+00 : f32
    %13 = vector.broadcast %cst : f32 to vector<8x128xf32>
    %14 = arith.select %12, %6, %13 : vector<8x128xi1>, vector<8x128xf32>
    %c0_4 = arith.constant 0 : index
    %c0_5 = arith.constant 0 : index
    %15 = vector.load %arg5[%c0_4, %c0_5] : memref<8x128xf32, #tpu.memory_space<vmem>>, vector<8x128xf32>
    %16 = vector.shape_cast %14 : vector<8x128xf32> to vector<1x8x128xf32>
    %cst_6 = arith.constant dense<0.000000e+00> : vector<8x128xf32>
    %17 = vector.multi_reduction <add>, %16, %cst_6 [0] : vector<1x8x128xf32> to vector<8x128xf32>
    %18 = arith.addf %15, %17 : vector<8x128xf32>
    %c0_7 = arith.constant 0 : index
    %c0_8 = arith.constant 0 : index
    %19 = vector.load %arg5[%c0_7, %c0_8] : memref<8x128xf32, #tpu.memory_space<vmem>>, vector<8x128xf32>
    tpu.vector_store %arg5[%c0_7, %c0_8], %18 {strides = array<i32>} : memref<8x128xf32, #tpu.memory_space<vmem>>, vector<8x128xf32>,
    %c0_i32_9 = arith.constant 0 : i32
    %20 = arith.cmpi eq, %arg0, %c0_i32_9 : i32
    %21 = arith.extui %20 : i1 to i32
    %c0_i32_10 = arith.constant 0 : i32
    %22 = arith.cmpi ne, %21, %c0_i32_10 : i32
    scf.if %22 {
      %c0_11 = arith.constant 0 : index
      %c0_12 = arith.constant 0 : index
      %23 = vector.load %arg3[%c0_11, %c0_12] : memref<8x128xf32, #tpu.memory_space<vmem>>, vector<8x128xf32>
      %cst_13 = arith.constant 0.000000e+00 : f32
      %24 = vector.broadcast %cst_13 : f32 to vector<8x128xf32>
      %25 = arith.subf %24, %23 : vector<8x128xf32>
      %cst_14 = arith.constant 0.000000e+00 : f32
      %26 = vector.broadcast %cst_14 : f32 to vector<8x128xf32>
      %27 = arith.maximumf %25, %26 : vector<8x128xf32>
      %28 = vector.shape_cast %27 : vector<8x128xf32> to vector<1x8x128xf32>
      %cst_15 = arith.constant dense<0.000000e+00> : vector<1xf32>
      %29 = vector.multi_reduction <add>, %28, %cst_15 [1, 2] : vector<1x8x128xf32> to vector<1xf32>
      %30 = vector.shape_cast %29 : vector<1xf32> to vector<1x1x1xf32>
      %31 = vector.extract %30[0, 0, 0] : f32 from vector<1x1x1xf32>
      %cst_16 = arith.constant 1.000000e+01 : f32
      %32 = arith.mulf %31, %cst_16 : f32
      %c0_17 = arith.constant 0 : index
      %c0_18 = arith.constant 0 : index
      %33 = vector.load %arg5[%c0_17, %c0_18] : memref<8x128xf32, #tpu.memory_space<vmem>>, vector<8x128xf32>
      %34 = vector.shape_cast %33 : vector<8x128xf32> to vector<1x8x128xf32>
      %cst_19 = arith.constant dense<0.000000e+00> : vector<1xf32>
      %35 = vector.multi_reduction <add>, %34, %cst_19 [1, 2] : vector<1x8x128xf32> to vector<1xf32>
      %36 = vector.shape_cast %35 : vector<1xf32> to vector<1x1x1xf32>
      %37 = vector.extract %36[0, 0, 0] : f32 from vector<1x1x1xf32>
      %cst_20 = arith.constant 7.812500e-03 : f32
      %38 = arith.mulf %37, %cst_20 : f32
      %39 = arith.addf %38, %32 : f32
      %c0_21 = arith.constant 0 : index
      %c0_22 = arith.constant 0 : index
      %40 = memref.load %arg4[%c0_21, %c0_22] : memref<1x1xf32, #tpu.memory_space<smem>>
      memref.store %39, %arg4[%c0_21, %c0_22] : memref<1x1xf32, #tpu.memory_space<smem>>
    } else {
    }
    return
  }
  func.func @transform_0(%arg0: i32) -> (i32, i32) {
    %c0_i32 = arith.constant 0 : i32
    %c0_i32_0 = arith.constant 0 : i32
    return %arg0, %c0_i32 : i32, i32
  }
  func.func @transform_1(%arg0: i32) -> (i32, i32) {
    %c0_i32 = arith.constant 0 : i32
    %c0_i32_0 = arith.constant 0 : i32
    return %arg0, %c0_i32 : i32, i32
  }
  func.func @transform_2(%arg0: i32) -> (i32, i32) {
    %c0_i32 = arith.constant 0 : i32
    %c0_i32_0 = arith.constant 0 : i32
    %c0_i32_1 = arith.constant 0 : i32
    return %c0_i32, %c0_i32_0 : i32, i32
  }
  func.func @transform_3(%arg0: i32) -> (i32, i32) {
    %c0_i32 = arith.constant 0 : i32
    %c0_i32_0 = arith.constant 0 : i32
    %c0_i32_1 = arith.constant 0 : i32
    return %c0_i32, %c0_i32_0 : i32, i32
  }
}

</mosaic_0001>

<bundles_post_ra>
// kernel: tpu_custom_call.1
= control target key start
LH: loop header
LB: loop body
LE: loop exit
PB: predicated region body
PF: predicated region fallthrough
CT: control target
= control target key end

     0   :  { %8 = vsyncpa [#allocation4], 0  ;;  %s239_s0 = inlined_call_operand.hbm [shape: f32[1,128], index: 0, kind: input, shape index: {}]   ;;  %s240_s1 = inlined_call_operand.vmem [shape: f32[1,128], index: 1, kind: input, shape index: {}]   ;;  %s241_s2 = inlined_call_operand.hbm [shape: f32[8,128], index: 2, kind: input, shape index: {}]   ;;  %s242_s3 = inlined_call_operand.hbm [shape: f32[1,1], index: 3, kind: output, shape index: {}]  }
   0x1   :  { %9 = vsyncpa [#allocation7], 0 }
   0x2   :  { %10 = vsyncpa [#allocation5], 0 }
   0x3   :  { %15 = vsyncadd [#allocation4], 112  ;;  %s175_s12 = smov [#allocation3]   ;;  %s115_s16 = scalar_lea.hbm %s239_s0, 16 }
   0x4   :  { %s16_s13 = sshll.u32 %s175_s12, 4  ;;  %p116_p0 = scmp.ne.s32.totalorder %s239_s0, %s115_s16  ;;  %s17_s13 = int_to_ptr.vmem [resolvable:$true] %s16_s13 }
   0x5   :  { %p119_p1 = scmp.lt.u32.totalorder %s115_s16, %s239_s0 }
   0x7   :  { %p121_p2 = pnand %p119_p1, %p116_p0 }
   0x9   :  { %124 = shalt.err (!%p121_p2)
}
   0xa   :  { %s125_s21 = scalar_lea.vmem %s17_s13, 16  ;;  %s129_s22 = scalar_lea.vmem %s17_s13, 128 }
   0xb   :  { %p126_p3 = scmp.ne.s32.totalorder %s17_s13, %s125_s21  ;;  %p130_p4 = scmp.lt.s32.totalorder %s17_s13, %s17_s13 }
   0xc   :  { %p131_p5 = scmp.lt.s32.totalorder %s129_s22, %s125_s21 }
   0xe   :  { %p132_p6 = por %p131_p5, %p130_p4 }
  0x10   :  { %p133_p7 = pnand %p132_p6, %p126_p3 }
  0x12   :  { %136 = shalt.err (!%p133_p7)
}
  0x13   :  { %s176_s23 = smov 16   ;;  %s177_s24 = smov 1  }
  0x14   :  { %22 = dma.hbm_to_vmem [thread:$0]  %s239_s0, 16, %s17_s13, [#allocation4], %s176_s23, %s176_s23, %s177_s24  }
  0x15   :  { %s178_s27 = smov [#allocation6]   ;;  %s137_s4 = scalar_lea.hbm %s241_s2, 128 }
  0x16   :  { %s31_s28 = sshll.u32 %s178_s27, 4  ;;  %p138_p8 = scmp.ne.s32.totalorder %s241_s2, %s137_s4  ;;  %s32_s28 = int_to_ptr.vmem [resolvable:$true] %s31_s28 }
  0x17   :  { %p141_p9 = scmp.lt.u32.totalorder %s137_s4, %s241_s2 }
  0x19   :  { %p143_p10 = pnand %p141_p9, %p138_p8 }
  0x1b   :  { %146 = shalt.err (!%p143_p10)
}
  0x1c   :  { %s147_s9 = scalar_lea.vmem %s32_s28, 128  ;;  %p152_p12 = scmp.lt.s32.totalorder %s32_s28, %s32_s28 }
  0x1d   :  { %p148_p11 = scmp.ne.s32.totalorder %s32_s28, %s147_s9  ;;  %p153_p13 = scmp.lt.s32.totalorder %s147_s9, %s147_s9 }
  0x1f   :  { %p154_p0 = por %p153_p13, %p152_p12 }
  0x21   :  { %p155_p1 = pnand %p154_p0, %p148_p11 }
  0x23   :  { %158 = shalt.err (!%p155_p1)
}
  0x24   :  { %34 = dma.hbm_to_vmem [thread:$0]  %s241_s2, 128, %s32_s28, [#allocation7]  }
  0x25   :  { %169 = dma.done.wait [#allocation4], 128  }
  0x26   :  { %170 = vsyncadd [#allocation4], 4294967168 }
  0x27   :  { %171 = dma.done.wait [#allocation7], 128  }
  0x28   :  { %172 = vsyncadd [#allocation7], 4294967168  ;;  %v51_v0 = vlaneseq  ;;  %v64_v2 = vld [vmem:[#allocation6] sm:$0xff]  ;;  %v46_v3 = vld [vmem:[#allocation3] sm:$0xff]  ;;  %s159_s18 = scalar_lea.hbm %s242_s3, 16 }
  0x29   :  { %v47_v4 = vld [vmem:[%s240_s1] sm:$0xff]  ;;  %v65_v5 = vsub.f32 0.0, %v64_v2  ;;  %p160_p2 = scmp.ne.s32.totalorder %s242_s3, %s159_s18  ;;  %p163_p3 = scmp.lt.u32.totalorder %s159_s18, %s242_s3 }
  0x2a   :  { %v52_v1 = vshrl.u32 %v51_v0, 7  ;;  %v48_v6 = vsub.f32 %v46_v3, %v47_v4 }
  0x2b   :  { %v66_v7 = vmax.f32 %v65_v5, 0.0  ;;  %p165_p4 = pnand %p163_p3, %p160_p2 }
  0x2c   :  { %v49_v8 = vmul.f32 %v48_v6, %v48_v6  ;;  %vm55_vm0 = vcmp.lt.s32.totalorder %v52_v1, 1 }
  0x2d   :  { %67 = vadd.xlane.f32.xlu0 %v66_v7 }
  0x2e   :  { %v56_v9 = vsel %vm55_vm0, %v49_v8, 0.0 }
  0x31   :  { %78 = vadd.xlane.f32.xlu0 %v56_v9 }
  0xba   :  { %v68_v10 = vpop.xlane.xlu0 %67 }
  0xbb   :  { %v69_v11 = vrot.slane %v68_v10, 4 }
  0xbd   :  { %v70_v12 = vadd.f32 %v69_v11, %v68_v10 }
  0xbe   :  { %v79_v13 = vpop.xlane.xlu0 %78 }
  0xbf   :  { %v71_v14 = vrot.slane %v70_v12, 2  ;;  %v80_v15 = vrot.slane %v79_v13, 4 }
  0xc1   :  { %v81_v16 = vadd.f32 %v80_v15, %v79_v13  ;;  %v72_v17 = vadd.f32 %v71_v14, %v70_v12 }
  0xc3   :  { %v82_v18 = vrot.slane %v81_v16, 2  ;;  %v73_v19 = vrot.slane %v72_v17, 1 }
  0xc5   :  { %v83_v20 = vadd.f32 %v82_v18, %v81_v16  ;;  %v74_v21 = vadd.f32 %v73_v19, %v72_v17 }
  0xc7   :  { %106 = vpush %v74_v21  ;;  %v84_v22 = vrot.slane %v83_v20, 1 }
  0xc9   :  { %v85_v23 = vadd.f32 %v84_v22, %v83_v20 }
  0xcb   :  { %108 = vpush %v85_v23 }
  0xf8   :  { %s107_s1 = spop %106 }
  0xf9   :  { %s76_s2 = smul.f32 10.0, %s107_s1 }
  0xfc   :  { %s109_s13 = spop %108 }
  0xfd   :  { %s87_s14 = smul.f32 0.0078125, %s109_s13 }
  0xff   :  { %s88_s15 = sadd.f32 %s87_s14, %s76_s2 }
 0x101   :  { %90 = sst [smem:[#allocation8]] %s88_s15 }
 0x102   :  { %168 = shalt.err (!%p165_p4)
}
 0x103   :  { %s179_s23 = smov [#allocation8]  }
 0x104   :  { %98 = dma.smem_to_hbm %s179_s23, 16, %s242_s3, [#allocation5]  }
 0x105   :  { %173 = dma.done.wait [#allocation5], 16  }
 0x106   :  { %174 = vsyncadd [#allocation5], 4294967280 }
 0x107   :  { %102 = sfence }
 0x108   :  { %103 = vsyncpa [#allocation4], 1 }
 0x109   :  { %104 = vsyncpa [#allocation7], 1 }
 0x10a   :  { %105 = vsyncpa [#allocation5], 1 }

</bundles_post_ra>
